<compile_context>
chip_gen: v6e
topology: v6e:2x2x1
jax: 0.10.0
libtpu: 0.0.40
codegen_flags: <defaults>
</compile_context>

<pallas_src>
import jax
import jax.numpy as jnp
from jax import lax
from jax.experimental import pallas as pl
from jax.experimental.pallas import tpu as pltpu

LANE = 128                      # every linear-layer output dim padded to 128 lanes
VMEM_LIMIT = 32 * 1024 * 1024   # explicit scoped-VMEM limit (v5e default is 16 MiB)


# --------------------------------------------------------------------------- #
# kernels
# --------------------------------------------------------------------------- #
def _edge_kernel(ea_ref, xcol_ref, we_ref, wnx_ref, wne_ref, enew_ref, msg_ref):
    """Per edge tile: e_new = relu([src|ea|1] @ We), msg = [xcol|1] @ Wnx + e_new @ Wne."""
    f32 = jnp.float32
    e_new = jnp.maximum(
        jnp.dot(ea_ref[...], we_ref[...], preferred_element_type=f32), 0.0)
    enew_ref[...] = e_new
    msg = jnp.dot(xcol_ref[...], wnx_ref[...], preferred_element_type=f32)
    msg = msg + jnp.dot(e_new.astype(jnp.bfloat16), wne_ref[...],
                        preferred_element_type=f32)
    msg_ref[...] = msg


def _node_kernel(msg_ref, row_ref, globb_ref, w2a_ref, w2g_ref, xnew_ref, agg_acc):
    """Grid (node tile i [parallel], edge tile k [arbitrary]):
       running scatter_max of msg into agg_acc, finalize node MLP at last k."""
    f32 = jnp.float32
    i = pl.program_id(0)
    k = pl.program_id(1)

    @pl.when(k == 0)
    def _init():
        agg_acc[...] = jnp.full_like(agg_acc, -jnp.inf)

    tn = agg_acc.shape[0]
    te = msg_ref.shape[0]
    # membership of this edge tile in this node tile: node n owns edge e iff row[e] == n
    node_ids = i * tn + lax.broadcasted_iota(jnp.int32, (tn, te), 0)
    owns = node_ids == row_ref[...]                                  # (tn, te)
    masked = jnp.where(owns[:, :, None], msg_ref[...][None, :, :], -jnp.inf)
    agg_acc[...] = jnp.maximum(agg_acc[...], jnp.max(masked, axis=1))

    @pl.when(k == pl.num_programs(1) - 1)
    def _finalize():
        agg = jnp.where(agg_acc[...] == -jnp.inf, 0.0, agg_acc[...])  # empty slot -> 0
        xn = jnp.dot(agg.astype(jnp.bfloat16), w2a_ref[...], preferred_element_type=f32)
        xn = xn + jnp.dot(globb_ref[...], w2g_ref[...], preferred_element_type=f32)
        xnew_ref[...] = jnp.maximum(xn, 0.0)


def _global_kernel(xnew_ref, batch_ref, glob_ref, invc_ref, wgu_ref, wgx_ref,
                   gnew_ref, gsum_acc):
    """Grid over node tiles (arbitrary): per-graph segment-sum of x_new, then
       global MLP with precomputed 1/count at the last tile."""
    f32 = jnp.float32
    i = pl.program_id(0)

    @pl.when(i == 0)
    def _init():
        gsum_acc[...] = jnp.zeros_like(gsum_acc)

    tn = xnew_ref.shape[0]
    b = gsum_acc.shape[0]
    member = batch_ref[...] == lax.broadcasted_iota(jnp.int32, (tn, b), 1)    # (tn, b)
    contrib = jnp.where(member[:, :, None], xnew_ref[...][:, None, :], 0.0)   # (tn, b, P)
    gsum_acc[...] += jnp.sum(contrib, axis=0)

    @pl.when(i == pl.num_programs(0) - 1)
    def _finalize():
        mean = gsum_acc[...] * invc_ref[...]
        g = jnp.dot(glob_ref[...], wgu_ref[...], preferred_element_type=f32)
        g = g + jnp.dot(mean.astype(jnp.bfloat16), wgx_ref[...],
                        preferred_element_type=f32)
        gnew_ref[...] = jnp.maximum(g, 0.0)


# --------------------------------------------------------------------------- #
# wrapper
# --------------------------------------------------------------------------- #
def _round_up(v, m):
    return ((v + m - 1) // m) * m


def _pad_to(a, rows, cols):
    return jnp.pad(a, ((0, rows - a.shape[0]), (0, cols - a.shape[1])))


def gn_block(x, edge_index, edge_attr, glob, batch, params,
             *, edge_tile=256, node_tile=32):
    """Pallas implementation of GN_block.forward. Returns (x_new, edge_new, glob_new)."""
    f32, bf16 = jnp.float32, jnp.bfloat16
    row = edge_index[0].astype(jnp.int32)
    col = edge_index[1].astype(jnp.int32)
    N, node_in = x.shape
    E, edge_in = edge_attr.shape
    B, global_in = glob.shape
    edge_out = params["be"].shape[-1]
    node_out = params["bn2"].shape[-1]
    global_out = params["bg"].shape[-1]
    P = LANE
    assert max(edge_out, node_out, global_out) <= P, "feature width > 128 unsupported"

    # tile sizes: either one full tile or a multiple of 16 (bf16 sublane packing)
    TE = min(edge_tile, _round_up(E, 8))
    TN = min(node_tile, _round_up(N, 8))
    E_pad = _round_up(E, TE)
    N_pad = _round_up(N, TN)
    n_et = E_pad // TE
    n_nt = N_pad // TN
    K1 = node_in + edge_in + 1      # [x[row] | edge_attr | 1]
    K2 = node_in + 1                # [x[col] | 1]
    G1 = global_in + 1              # [glob | 1]

    # ---- wrapper glue: gathers + pre-concat + padding (TODO: scalar prefetch) ----
    ones_e = jnp.ones((E, 1), f32)
    src = jnp.take(x, row, axis=0)
    xcol = jnp.take(x, col, axis=0)
    globb = jnp.take(glob, batch, axis=0)

    ea_in = _pad_to(jnp.concatenate([src, edge_attr, ones_e], 1), E_pad, K1).astype(bf16)
    xcol_in = _pad_to(jnp.concatenate([xcol, ones_e], 1), E_pad, K2).astype(bf16)
    globb_in = _pad_to(jnp.concatenate([globb, jnp.ones((N, 1), f32)], 1),
                       N_pad, G1).astype(bf16)
    glob_in = jnp.concatenate([glob, jnp.ones((B, 1), f32)], 1).astype(bf16)

    # sentinel -1 for padded edges / nodes so they never match a real segment
    row_ids = jnp.full((1, E_pad), -1, jnp.int32).at[0, :E].set(row)
    batch_ids = jnp.full((N_pad, 1), -1, jnp.int32).at[:N, 0].set(batch.astype(jnp.int32))

    counts = jax.ops.segment_sum(jnp.ones((N,), f32), batch, num_segments=B)
    inv_cnt = (1.0 / jnp.maximum(counts, 1.0)).reshape(B, 1).astype(f32)

    # biases folded in as an extra weight row; out-dims zero-padded to 128 lanes
    W_e = _pad_to(jnp.concatenate([params["we"], params["be"]], 0), K1, P).astype(bf16)
    W_nx = _pad_to(jnp.concatenate([params["wn"][:node_in], params["bn"]], 0),
                   K2, P).astype(bf16)
    W_ne = _pad_to(params["wn"][node_in:], P, P).astype(bf16)
    W_2a = _pad_to(params["wn2"][:node_out], P, P).astype(bf16)
    W_2g = _pad_to(jnp.concatenate([params["wn2"][node_out:], params["bn2"]], 0),
                   G1, P).astype(bf16)
    W_gu = _pad_to(jnp.concatenate([params["wg"][:global_in], params["bg"]], 0),
                   G1, P).astype(bf16)
    W_gx = _pad_to(params["wg"][global_in:], P, P).astype(bf16)

    # ---- stage 1: edge model + node messages (grid over edge tiles, parallel) ----
    e_new_p, msg_p = pl.pallas_call(
        _edge_kernel,
        out_shape=(jax.ShapeDtypeStruct((E_pad, P), f32),
                   jax.ShapeDtypeStruct((E_pad, P), f32)),
        grid=(n_et,),
        in_specs=[pl.BlockSpec((TE, K1), lambda i: (i, 0)),
                  pl.BlockSpec((TE, K2), lambda i: (i, 0)),
                  pl.BlockSpec((K1, P), lambda i: (0, 0)),
                  pl.BlockSpec((K2, P), lambda i: (0, 0)),
                  pl.BlockSpec((P, P), lambda i: (0, 0))],
        out_specs=(pl.BlockSpec((TE, P), lambda i: (i, 0)),
                   pl.BlockSpec((TE, P), lambda i: (i, 0))),
        compiler_params=pltpu.CompilerParams(
            dimension_semantics=("parallel",), vmem_limit_bytes=VMEM_LIMIT),
        cost_estimate=pl.CostEstimate(
            flops=2 * E_pad * (K1 + K2 + P) * P,
            transcendentals=0,
            bytes_accessed=E_pad * (K1 + K2) * 2 + (K1 + K2 + P) * P * 2
                           + 2 * E_pad * P * 4),
    )(ea_in, xcol_in, W_e, W_nx, W_ne)

    # ---- stage 2: scatter_max + node MLP (node tiles parallel, edge tiles reduce) ----
    x_new_p = pl.pallas_call(
        _node_kernel,
        out_shape=jax.ShapeDtypeStruct((N_pad, P), f32),
        grid=(n_nt, n_et),
        in_specs=[pl.BlockSpec((TE, P), lambda i, k: (k, 0)),
                  pl.BlockSpec((1, TE), lambda i, k: (0, k)),
                  pl.BlockSpec((TN, G1), lambda i, k: (i, 0)),
                  pl.BlockSpec((P, P), lambda i, k: (0, 0)),
                  pl.BlockSpec((G1, P), lambda i, k: (0, 0))],
        out_specs=pl.BlockSpec((TN, P), lambda i, k: (i, 0)),
        scratch_shapes=[pltpu.VMEM((TN, P), f32)],
        compiler_params=pltpu.CompilerParams(
            dimension_semantics=("parallel", "arbitrary"),
            vmem_limit_bytes=VMEM_LIMIT),
        cost_estimate=pl.CostEstimate(
            flops=3 * n_nt * E_pad * TN * P + 2 * N_pad * (P + G1) * P,
            transcendentals=0,
            bytes_accessed=n_nt * E_pad * (P * 4 + 4) + N_pad * (G1 * 2 + P * 4)
                           + (P + G1) * P * 2),
    )(msg_p, row_ids, globb_in, W_2a, W_2g)

    # ---- stage 3: scatter_mean + global MLP (reduction over node tiles) ----
    g_new_p = pl.pallas_call(
        _global_kernel,
        out_shape=jax.ShapeDtypeStruct((B, P), f32),
        grid=(n_nt,),
        in_specs=[pl.BlockSpec((TN, P), lambda i: (i, 0)),
                  pl.BlockSpec((TN, 1), lambda i: (i, 0)),
                  pl.BlockSpec((B, G1), lambda i: (0, 0)),
                  pl.BlockSpec((B, 1), lambda i: (0, 0)),
                  pl.BlockSpec((G1, P), lambda i: (0, 0)),
                  pl.BlockSpec((P, P), lambda i: (0, 0))],
        out_specs=pl.BlockSpec((B, P), lambda i: (0, 0)),
        scratch_shapes=[pltpu.VMEM((B, P), f32)],
        compiler_params=pltpu.CompilerParams(
            dimension_semantics=("arbitrary",), vmem_limit_bytes=VMEM_LIMIT),
        cost_estimate=pl.CostEstimate(
            flops=N_pad * B * P + 2 * B * (G1 + P) * P,
            transcendentals=0,
            bytes_accessed=N_pad * (P * 4 + 4) + B * (G1 * 2 + P * 4)
                           + (G1 + P) * P * 2),
    )(x_new_p, batch_ids, glob_in, inv_cnt, W_gu, W_gx)

    return (x_new_p[:N, :node_out], e_new_p[:E, :edge_out], g_new_p[:, :global_out])


# --------------------------------------------------------------------------- #
# params / reference / self-test
# --------------------------------------------------------------------------- #
def init_params(key, node_in, edge_in, global_in, hid,
                node_out, edge_out, global_out):
    """PyTorch-style Linear init: uniform(-1/sqrt(fan_in), +1/sqrt(fan_in))."""
    del hid  # unused by the module's MLPs
    ks = jax.random.split(key, 8)

    def lin(kw, kb, fan_in, fan_out):
        bound = 1.0 / float(fan_in) ** 0.5
        w = jax.random.uniform(kw, (fan_in, fan_out), jnp.float32, -bound, bound)
        b = jax.random.uniform(kb, (1, fan_out), jnp.float32, -bound, bound)
        return w, b

    we, be = lin(ks[0], ks[1], node_in + edge_in, edge_out)
    wn, bn = lin(ks[2], ks[3], node_in + edge_out, node_out)
    wn2, bn2 = lin(ks[4], ks[5], node_out + global_in, node_out)
    wg, bg = lin(ks[6], ks[7], global_in + node_out, global_out)
    return dict(we=we, be=be, wn=wn, bn=bn, wn2=wn2, bn2=bn2, wg=wg, bg=bg)


def gn_ref(x, edge_index, ea, glob, batch, params):
    """Pure-JAX (f32) reference of the same forward for the correctness check."""
    row, col = edge_index[0], edge_index[1]
    relu = lambda v: jnp.maximum(v, 0.0)
    N, B = x.shape[0], glob.shape[0]

    e_new = relu(jnp.concatenate([x[row], ea], 1) @ params["we"] + params["be"])
    msg = jnp.concatenate([x[col], e_new], 1) @ params["wn"] + params["bn"]
    agg = jax.ops.segment_max(msg, row, num_segments=N)
    agg = jnp.where(jnp.isneginf(agg), 0.0, agg)
    x_new = relu(jnp.concatenate([agg, glob[batch]], 1) @ params["wn2"] + params["bn2"])
    ssum = jax.ops.segment_sum(x_new, batch, num_segments=B)
    cnt = jnp.maximum(jax.ops.segment_sum(jnp.ones((N,), jnp.float32), batch,
                                          num_segments=B), 1.0)
    mean = ssum / cnt[:, None]
    g_new = relu(jnp.concatenate([glob, mean], 1) @ params["wg"] + params["bg"])
    return x_new, e_new, g_new


if __name__ == "__main__":
    # module dims
    node_in, edge_in, global_in, hid = 8, 4, 4, 16
    node_out, edge_out, global_out = 8, 8, 4
    # graph sizes
    N, E, B = 8, 16, 2

    key = jax.random.PRNGKey(0)
    kx, ke, kg, kp = jax.random.split(key, 4)
    x = jax.random.normal(kx, (N, node_in), jnp.float32)
    edge_attr = jax.random.normal(ke, (E, edge_in), jnp.float32)
    glob = jax.random.normal(kg, (B, global_in), jnp.float32)
    row = jnp.array([0, 1, 2, 3, 4, 5, 6, 7, 0, 1, 2, 3, 4, 5, 6, 7], jnp.int32)
    col = jnp.array([1, 2, 3, 0, 5, 6, 7, 4, 2, 3, 0, 1, 6, 7, 4, 5], jnp.int32)
    edge_index = jnp.stack([row, col])
    batch = jnp.array([0, 0, 0, 0, 1, 1, 1, 1], jnp.int32)

    params = init_params(kp, node_in, edge_in, global_in, hid,
                         node_out, edge_out, global_out)

    x_new, e_new, g_new = gn_block(x, edge_index, edge_attr, glob, batch, params)
    jax.block_until_ready((x_new, e_new, g_new))

    xr, er, gr = gn_ref(x, edge_index, edge_attr, glob, batch, params)
    # bf16 MXU operands with f32 accumulation -> relaxed tolerance vs f32 reference
    assert jnp.allclose(e_new, er, atol=5e-2, rtol=5e-2), "edge output mismatch"
    assert jnp.allclose(x_new, xr, atol=5e-2, rtol=5e-2), "node output mismatch"
    assert jnp.allclose(g_new, gr, atol=5e-2, rtol=5e-2), "global output mismatch"

    print("KERNEL_OK")
</pallas_src>

<mosaic_0001>
module attributes {stable_mosaic.version = 11 : i64} {
  func.func @_edge_kernel(%arg0: i32, %arg1: memref<16x13xbf16, #tpu.memory_space<vmem>>, %arg2: memref<16x9xbf16, #tpu.memory_space<vmem>>, %arg3: memref<13x128xbf16, #tpu.memory_space<vmem>>, %arg4: memref<9x128xbf16, #tpu.memory_space<vmem>>, %arg5: memref<128x128xbf16, #tpu.memory_space<vmem>>, %arg6: memref<16x128xf32, #tpu.memory_space<vmem>>, %arg7: memref<16x128xf32, #tpu.memory_space<vmem>>) attributes {dimension_semantics = [#tpu.dimension_semantics<parallel>], iteration_bounds = array<i64: 1>, scalar_prefetch = 0 : i64, scratch_operands = 0 : i64, tpu.core_type = #tpu.core_type<tc>, window_params = [{transform_indices = @transform_0, window_bounds = array<i64: 16, 13>}, {transform_indices = @transform_1, window_bounds = array<i64: 16, 9>}, {pipeline_mode = #tpu.pipeline_mode<synchronous>, transform_indices = @transform_2, window_bounds = array<i64: 13, 128>}, {pipeline_mode = #tpu.pipeline_mode<synchronous>, transform_indices = @transform_3, window_bounds = array<i64: 9, 128>}, {pipeline_mode = #tpu.pipeline_mode<synchronous>, transform_indices = @transform_4, window_bounds = array<i64: 128, 128>}, {transform_indices = @transform_5, window_bounds = array<i64: 16, 128>}, {transform_indices = @transform_6, window_bounds = array<i64: 16, 128>}]} {
    %c0 = arith.constant 0 : index
    %c0_0 = arith.constant 0 : index
    %0 = vector.load %arg1[%c0, %c0_0] : memref<16x13xbf16, #tpu.memory_space<vmem>>, vector<16x13xbf16>
    %c0_1 = arith.constant 0 : index
    %c0_2 = arith.constant 0 : index
    %1 = vector.load %arg3[%c0_1, %c0_2] : memref<13x128xbf16, #tpu.memory_space<vmem>>, vector<13x128xbf16>
    %cst = arith.constant dense<0.000000e+00> : vector<16x128xf32>
    %2 = tpu.matmul %0, %1, %cst {dimension_numbers = #tpu.dot_dimension_numbers<[1], [0], [0], [1], [0, 0, 1, 1], [], []>} : vector<16x13xbf16>, vector<13x128xbf16>, vector<16x128xf32> -> vector<16x128xf32>
    %cst_3 = arith.constant 0.000000e+00 : f32
    %3 = vector.broadcast %cst_3 : f32 to vector<16x128xf32>
    %4 = arith.maximumf %2, %3 : vector<16x128xf32>
    %c0_4 = arith.constant 0 : index
    %c0_5 = arith.constant 0 : index
    %5 = vector.load %arg6[%c0_4, %c0_5] : memref<16x128xf32, #tpu.memory_space<vmem>>, vector<16x128xf32>
    tpu.vector_store %arg6[%c0_4, %c0_5], %4 {strides = array<i32>} : memref<16x128xf32, #tpu.memory_space<vmem>>, vector<16x128xf32>,
    %c0_6 = arith.constant 0 : index
    %c0_7 = arith.constant 0 : index
    %6 = vector.load %arg2[%c0_6, %c0_7] : memref<16x9xbf16, #tpu.memory_space<vmem>>, vector<16x9xbf16>
    %c0_8 = arith.constant 0 : index
    %c0_9 = arith.constant 0 : index
    %7 = vector.load %arg4[%c0_8, %c0_9] : memref<9x128xbf16, #tpu.memory_space<vmem>>, vector<9x128xbf16>
    %cst_10 = arith.constant dense<0.000000e+00> : vector<16x128xf32>
    %8 = tpu.matmul %6, %7, %cst_10 {dimension_numbers = #tpu.dot_dimension_numbers<[1], [0], [0], [1], [0, 0, 1, 1], [], []>} : vector<16x9xbf16>, vector<9x128xbf16>, vector<16x128xf32> -> vector<16x128xf32>
    %9 = arith.truncf %4 : vector<16x128xf32> to vector<16x128xbf16>
    %c0_11 = arith.constant 0 : index
    %c0_12 = arith.constant 0 : index
    %10 = vector.load %arg5[%c0_11, %c0_12] : memref<128x128xbf16, #tpu.memory_space<vmem>>, vector<128x128xbf16>
    %cst_13 = arith.constant dense<0.000000e+00> : vector<16x128xf32>
    %11 = tpu.matmul %9, %10, %cst_13 {dimension_numbers = #tpu.dot_dimension_numbers<[1], [0], [0], [1], [0, 0, 1, 1], [], []>} : vector<16x128xbf16>, vector<128x128xbf16>, vector<16x128xf32> -> vector<16x128xf32>
    %12 = arith.addf %8, %11 : vector<16x128xf32>
    %c0_14 = arith.constant 0 : index
    %c0_15 = arith.constant 0 : index
    %13 = vector.load %arg7[%c0_14, %c0_15] : memref<16x128xf32, #tpu.memory_space<vmem>>, vector<16x128xf32>
    tpu.vector_store %arg7[%c0_14, %c0_15], %12 {strides = array<i32>} : memref<16x128xf32, #tpu.memory_space<vmem>>, vector<16x128xf32>,
    return
  }
  func.func @transform_0(%arg0: i32) -> (i32, i32) {
    %c0_i32 = arith.constant 0 : i32
    %c0_i32_0 = arith.constant 0 : i32
    return %arg0, %c0_i32 : i32, i32
  }
  func.func @transform_1(%arg0: i32) -> (i32, i32) {
    %c0_i32 = arith.constant 0 : i32
    %c0_i32_0 = arith.constant 0 : i32
    return %arg0, %c0_i32 : i32, i32
  }
  func.func @transform_2(%arg0: i32) -> (i32, i32) {
    %c0_i32 = arith.constant 0 : i32
    %c0_i32_0 = arith.constant 0 : i32
    %c0_i32_1 = arith.constant 0 : i32
    return %c0_i32, %c0_i32_0 : i32, i32
  }
  func.func @transform_3(%arg0: i32) -> (i32, i32) {
    %c0_i32 = arith.constant 0 : i32
    %c0_i32_0 = arith.constant 0 : i32
    %c0_i32_1 = arith.constant 0 : i32
    return %c0_i32, %c0_i32_0 : i32, i32
  }
  func.func @transform_4(%arg0: i32) -> (i32, i32) {
    %c0_i32 = arith.constant 0 : i32
    %c0_i32_0 = arith.constant 0 : i32
    %c0_i32_1 = arith.constant 0 : i32
    return %c0_i32, %c0_i32_0 : i32, i32
  }
  func.func @transform_5(%arg0: i32) -> (i32, i32) {
    %c0_i32 = arith.constant 0 : i32
    %c0_i32_0 = arith.constant 0 : i32
    return %arg0, %c0_i32 : i32, i32
  }
  func.func @transform_6(%arg0: i32) -> (i32, i32) {
    %c0_i32 = arith.constant 0 : i32
    %c0_i32_0 = arith.constant 0 : i32
    return %arg0, %c0_i32 : i32, i32
  }
}

</mosaic_0001>

<bundles_post_ra>
// kernel: tpu_custom_call.1
= control target key start
LH: loop header
LB: loop body
LE: loop exit
PB: predicated region body
PF: predicated region fallthrough
CT: control target
= control target key end

     0   :  { %12 = vsyncpa [#allocation3], 0  ;;  %s695_s0 = inlined_call_operand.hbm [shape: bf16[16,13], index: 0, kind: input, shape index: {}]   ;;  %s696_s1 = inlined_call_operand.hbm [shape: bf16[16,9], index: 1, kind: input, shape index: {}]   ;;  %s697_s2 = inlined_call_operand.hbm [shape: bf16[13,128], index: 2, kind: input, shape index: {}]   ;;  %s698_s3 = inlined_call_operand.hbm [shape: bf16[9,128], index: 3, kind: input, shape index: {}]   ;;  %s699_s4 = inlined_call_operand.hbm [shape: bf16[128,128], index: 4, kind: input, shape index: {}]   ;;  %s700_s5 = inlined_call_operand.hbm [shape: f32[16,128], index: 5, kind: output, shape index: {0}]   ;;  %s701_s6 = inlined_call_operand.hbm [shape: f32[16,128], index: 6, kind: output, shape index: {1}]  }
   0x1   :  { %13 = vsyncpa [#allocation6], 0 }
   0x2   :  { %14 = vsyncpa [#allocation9], 0 }
   0x3   :  { %15 = vsyncpa [#allocation4], 0 }
   0x4   :  { %16 = vsyncpa [#allocation13], 0  ;;  %s607_s21 = smov [#allocation5]   ;;  %s608_s23 = smov [#allocation8]  }
   0x5   :  { %s34_s22 = sshll.u32 %s607_s21, 4  ;;  %s58_s24 = sshll.u32 %s608_s23, 4  ;;  %s35_s22 = int_to_ptr.vmem [resolvable:$true] %s34_s22  ;;  %s59_s24 = int_to_ptr.vmem [resolvable:$true] %s58_s24 }
   0x6   :  { %s465_s25 = scalar_lea.vmem %s35_s22, 128  ;;  %p470_p1 = scmp.lt.s32.totalorder %s35_s22, %s35_s22 }
   0x7   :  { %p466_p0 = scmp.ne.s32.totalorder %s35_s22, %s465_s25  ;;  %p471_p2 = scmp.lt.s32.totalorder %s465_s25, %s465_s25 }
   0x9   :  { %p472_p3 = por %p471_p2, %p470_p1 }
   0xb   :  { %p473_p4 = pnand %p472_p3, %p466_p0 }
   0xd   :  { %476 = shalt.err (!%p473_p4)
}
   0xe   :  { %s609_s26 = smov 64   ;;  %s610_s27 = smov 4  }
   0xf   :  { %40 = dma.hbm_to_vmem [thread:$0]  %s696_s1, 128, %s35_s22, [#allocation6], %s609_s26, %s609_s26, %s610_s27  }
  0x10   :  { %s485_s30 = scalar_lea.vmem %s59_s24, 128  ;;  %p490_p6 = scmp.lt.s32.totalorder %s59_s24, %s59_s24 }
  0x11   :  { %p486_p5 = scmp.ne.s32.totalorder %s59_s24, %s485_s30  ;;  %p491_p7 = scmp.lt.s32.totalorder %s485_s30, %s485_s30 }
  0x13   :  { %p492_p8 = por %p491_p7, %p490_p6 }
  0x15   :  { %p493_p9 = pnand %p492_p8, %p486_p5 }
  0x17   :  { %496 = shalt.err (!%p493_p9)
}
  0x18   :  { %64 = dma.hbm_to_vmem [thread:$0]  %s698_s3, 128, %s59_s24, [#allocation9], %s609_s26, %s609_s26, %s610_s27  }
  0x19   :  { %s611_s9 = smov [#allocation2]   ;;  %s612_s11 = smov [#allocation7]  }
  0x1a   :  { %s22_s10 = sshll.u32 %s611_s9, 4  ;;  %s46_s12 = sshll.u32 %s612_s11, 4  ;;  %s23_s10 = int_to_ptr.vmem [resolvable:$true] %s22_s10  ;;  %s47_s12 = int_to_ptr.vmem [resolvable:$true] %s46_s12 }
  0x1b   :  { %s505_s1 = scalar_lea.vmem %s23_s10, 128  ;;  %p510_p11 = scmp.lt.s32.totalorder %s23_s10, %s23_s10 }
  0x1c   :  { %p506_p10 = scmp.ne.s32.totalorder %s23_s10, %s505_s1  ;;  %p511_p12 = scmp.lt.s32.totalorder %s505_s1, %s505_s1 }
  0x1e   :  { %p512_p13 = por %p511_p12, %p510_p11 }
  0x20   :  { %p513_p0 = pnand %p512_p13, %p506_p10 }
  0x22   :  { %516 = shalt.err (!%p513_p0)
}
  0x23   :  { %28 = dma.hbm_to_vmem [thread:$0]  %s695_s0, 128, %s23_s10, [#allocation3], %s609_s26, %s609_s26, %s610_s27  }
  0x24   :  { %s525_s3 = scalar_lea.vmem %s47_s12, 128  ;;  %p530_p2 = scmp.lt.s32.totalorder %s47_s12, %s47_s12 }
  0x25   :  { %p526_p1 = scmp.ne.s32.totalorder %s47_s12, %s525_s3  ;;  %p531_p3 = scmp.lt.s32.totalorder %s525_s3, %s525_s3 }
  0x27   :  { %p532_p4 = por %p531_p3, %p530_p2 }
  0x29   :  { %p533_p5 = pnand %p532_p4, %p526_p1 }
  0x2b   :  { %536 = shalt.err (!%p533_p5)
}
  0x2c   :  { %52 = dma.hbm_to_vmem [thread:$0]  %s697_s2, 128, %s47_s12, [#allocation6], %s609_s26, %s609_s26, %s610_s27  }
  0x2d   :  { %s613_s17 = smov [#allocation10]  }
  0x2e   :  { %s70_s18 = sshll.u32 %s613_s17, 4  ;;  %s71_s18 = int_to_ptr.vmem [resolvable:$true] %s70_s18 }
  0x2f   :  { %s545_s19 = scalar_lea.vmem %s71_s18, 1024  ;;  %p550_p7 = scmp.lt.s32.totalorder %s71_s18, %s71_s18 }
  0x30   :  { %p546_p6 = scmp.ne.s32.totalorder %s71_s18, %s545_s19  ;;  %p551_p8 = scmp.lt.s32.totalorder %s545_s19, %s545_s19 }
  0x32   :  { %p552_p9 = por %p551_p8, %p550_p7 }
  0x34   :  { %p553_p10 = pnand %p552_p9, %p546_p6 }
  0x36   :  { %556 = shalt.err (!%p553_p10)
}
  0x37   :  { %76 = dma.hbm_to_vmem [thread:$0]  %s699_s4, 1024, %s71_s18, [#allocation9], %s609_s26, %s609_s26, %s610_s27  }
  0x38   :  { %597 = dma.done.wait [#allocation3], 128  }
  0x39   :  { %598 = vsyncadd [#allocation3], 4294967168 }
  0x3a   :  { %599 = dma.done.wait [#allocation6], 256  }
  0x3b   :  { %600 = vsyncadd [#allocation6], 4294967040 }
  0x3c   :  { %601 = dma.done.wait [#allocation9], 1152  }
  0x3d   :  { %602 = vsyncadd [#allocation9], 4294966144  ;;  %vm111_vm0 = vcmask 1045504   ;;  %v614_v0 = vmov 0.0   ;;  %vm615_vm1 = vmmov 0   ;;  %vm112_vm2 = vcmask 1046528  }
  0x3e   :  { %399 = vmatprep.subr.bf16.mxu0 %v614_v0  ;;  %405 = vmatprep.subr.bf16.mxu1 %v614_v0  ;;  %v616_v1 = vmov 65535   ;;  %v445_v4 = vld [vmem:[#allocation7] sm:$0x7f]   ;;  %v447_v6 = vld [vmem:[#allocation10 + $0x38] sm:$0xff]   ;;  %v446_v7 = vld [vmem:[#allocation2] sm:$0xff]   ;;  %vm107_vm3 = vcmask 105472  }
  0x3f   :  { %401 = vmatprep.mubr.msk.bf16.mxu0 %vm615_vm1, %v614_v0  ;;  %421 = vmatprep.mubr.msk.bf16.mxu1 %vm615_vm1, %v614_v0  ;;  %v113_v2 = vsel %vm111_vm0, 4294967295, %v616_v1  ;;  %v448_v8 = vld [vmem:[#allocation10 + $0x30] sm:$0xff]   ;;  %v449_v9 = vld [vmem:[#allocation10 + $0x28] sm:$0xff]   ;;  %v450_v10 = vld [vmem:[#allocation10 + $0x20] sm:$0xff]   ;;  %vm287_vm4 = vcmask 1043456   ;;  %vm288_vm5 = vcmask 1044480  }
  0x40   :  { %v114_v3 = vsel %vm112_vm2, %v113_v2, 0  ;;  %406 = vmatpush3.bf16.msra.mxu1 %v447_v6  ;;  %v451_v11 = vld [vmem:[#allocation10 + $0x18] sm:$0xff]   ;;  %v452_v12 = vld [vmem:[#allocation10 + $0x10] sm:$0xff]   ;;  %v289_v13 = vsel %vm287_vm4, 4294967295, %v616_v1  ;;  %v454_v17 = vld [vmem:[#allocation10 + $0x8] sm:$0xff]   ;;  %vm283_vm6 = vcmask 72704  }
  0x41   :  { %v116_v5 = vand.u32 %v445_v4, %v114_v3  ;;  %407 = vmatprep.subr.bf16.mxu1 %v614_v0  ;;  %v290_v14 = vsel %vm288_vm5, %v289_v13, 0  ;;  %v453_v15 = vld [vmem:[#allocation8] sm:$0x1f]   ;;  %v455_v18 = vld [vmem:[#allocation5] sm:$0xff]   ;;  %v456_v19 = vld [vmem:[#allocation10] sm:$0xff]   ;;  %s617_s2 = smov [#allocation11]  }
  0x42   :  { %v292_v16 = vand.u32 %v453_v15, %v290_v14  ;;  %s342_s4 = sshll.u32 %s617_s2, 4  ;;  %s343_s4 = int_to_ptr.vmem [resolvable:$true] %s342_s4 }
  0x43   :  { %400 = vmatpush3.bf16.msra.mxu0 %v116_v5  ;;  %s557_s21 = scalar_lea.vmem %s343_s4, 256  ;;  %p562_p12 = scmp.lt.s32.totalorder %s343_s4, %s343_s4 }
  0x44   :  { %425 = vmatprep.subr.bf16.mxu0 %v614_v0  ;;  %408 = vmatpush3.bf16.msra.mxu1 %v448_v8  ;;  %p558_p11 = scmp.ne.s32.totalorder %s343_s4, %s557_s21  ;;  %p563_p13 = scmp.lt.s32.totalorder %s557_s21, %s557_s21 }
  0x45   :  { %409 = vmatprep.subr.bf16.mxu1 %v614_v0 }
  0x46   :  { %402 = vmatmul.mubr.msk.bf16.vlgmr.msra.gmra.mxu0 %vm107_vm3, %v446_v7  ;;  %p564_p0 = por %p563_p13, %p562_p12 }
  0x47   :  { %427 = vmatprep.mubr.msk.bf16.mxu0 %vm615_vm1, %v614_v0  ;;  %426 = vmatpush3.bf16.msra.mxu0 %v292_v16 }
  0x48   :  { %410 = vmatpush3.bf16.msra.mxu1 %v449_v9  ;;  %p565_p1 = pnand %p564_p0, %p558_p11 }
  0x49   :  { %411 = vmatprep.subr.bf16.mxu1 %v614_v0 }
  0x4c   :  { %412 = vmatpush3.bf16.msra.mxu1 %v450_v10 }
  0x4d   :  { %413 = vmatprep.subr.bf16.mxu1 %v614_v0 }
  0x4e   :  { %428 = vmatmul.mubr.msk.bf16.vlgmr.msra.gmra.mxu0 %vm283_vm6, %v455_v18 }
  0x50   :  { %414 = vmatpush3.bf16.msra.mxu1 %v451_v11 }
  0x51   :  { %415 = vmatprep.subr.bf16.mxu1 %v614_v0 }
  0x54   :  { %416 = vmatpush3.bf16.msra.mxu1 %v452_v12 }
  0x55   :  { %417 = vmatprep.subr.bf16.mxu1 %v614_v0 }
  0x58   :  { %418 = vmatpush3.bf16.msra.mxu1 %v454_v17 }
  0x59   :  { %419 = vmatprep.subr.bf16.mxu1 %v614_v0 }
  0x5c   :  { %420 = vmatpush3.bf16.msra.mxu1 %v456_v19 }
 0x106   :  { %v152_v20 = vpop.f32.mrf.mxu0 }
 0x107   :  { %v159_v21 = vmax.f32 %v152_v20, 0.0 }
 0x108   :  { %v403_v22 = vpop.f32.mrf.mxu0 }
 0x109   :  { %161 = vst [vmem:[#allocation11] sm:$0xff] %v159_v21 }
 0x10a   :  { %v155_v23 = vpop.f32.mrf.mxu0 }
 0x10b   :  { %v160_v24 = vmax.f32 %v155_v23, 0.0 }
 0x10c   :  { %v404_v25 = vpop.f32.mrf.mxu0 }
 0x10d   :  { %162 = vst [vmem:[#allocation11 + $0x8] sm:$0xff] %v160_v24  ;;  %v167_v26 = vpack.c.bf16 %v160_v24, %v159_v21 }
 0x10e   :  { %v328_v27 = vpop.f32.mrf.mxu0 }
 0x10f   :  { %422 = vmatmul.mubr.bf16.vlgmr.msra.gmra.mxu1 %v167_v26 }
 0x110   :  { %v429_v28 = vpop.f32.mrf.mxu0 }
 0x112   :  { %v331_v29 = vpop.f32.mrf.mxu0 }
 0x114   :  { %v430_v30 = vpop.f32.mrf.mxu0 }
 0x115   :  { %568 = shalt.err (!%p565_p1)
}
 0x116   :  { %s618_s22 = smov 128   ;;  %s619_s23 = smov 8  }
 0x117   :  { %348 = dma.vmem_to_hbm [thread:$0]  %s343_s4, 256, %s700_s5, [#allocation4], %s618_s22, %s618_s22, %s619_s23  }
 0x118   :  { %s620_s26 = smov [#allocation12]  }
 0x119   :  { %s354_s27 = sshll.u32 %s620_s26, 4  ;;  %s355_s27 = int_to_ptr.vmem [resolvable:$true] %s354_s27 }
 0x11a   :  { %s577_s28 = scalar_lea.vmem %s355_s27, 256  ;;  %p582_p3 = scmp.lt.s32.totalorder %s355_s27, %s355_s27 }
 0x11b   :  { %p578_p2 = scmp.ne.s32.totalorder %s355_s27, %s577_s28  ;;  %p583_p4 = scmp.lt.s32.totalorder %s577_s28, %s577_s28 }
 0x11d   :  { %p584_p5 = por %p583_p4, %p582_p3 }
 0x11f   :  { %p585_p6 = pnand %p584_p5, %p578_p2 }
 0x1cf   :  { %v266_v31 = vpop.f32.mrf.mxu1 }
 0x1d0   :  { %v329_v32 = vadd.f32 %v328_v27, %v266_v31 }
 0x1d1   :  { %v423_v33 = vpop.f32.mrf.mxu1 }
 0x1d2   :  { %335 = vst [vmem:[#allocation12] sm:$0xff] %v329_v32 }
 0x1d3   :  { %v269_v34 = vpop.f32.mrf.mxu1 }
 0x1d4   :  { %v332_v35 = vadd.f32 %v331_v29, %v269_v34 }
 0x1d5   :  { %v424_v36 = vpop.f32.mrf.mxu1 }
 0x1d6   :  { %336 = vst [vmem:[#allocation12 + $0x8] sm:$0xff] %v332_v35 }
 0x1d7   :  { %588 = shalt.err (!%p585_p6)
}
 0x1d8   :  { %360 = dma.vmem_to_hbm [thread:$0]  %s355_s27, 256, %s701_s6, [#allocation13], %s618_s22, %s618_s22, %s619_s23  }
 0x1d9   :  { %603 = dma.done.wait [#allocation4], 256  }
 0x1da   :  { %604 = vsyncadd [#allocation4], 4294967040 }
 0x1db   :  { %605 = dma.done.wait [#allocation13], 256  }
 0x1dc   :  { %606 = vsyncadd [#allocation13], 4294967040 }
 0x1dd   :  { %367 = vsyncpa [#allocation3], 1 }
 0x1de   :  { %368 = vsyncpa [#allocation6], 1 }
 0x1df   :  { %369 = vsyncpa [#allocation9], 1 }
 0x1e0   :  { %370 = vsyncpa [#allocation4], 1 }
 0x1e1   :  { %371 = vsyncpa [#allocation13], 1 }

</bundles_post_ra>
